<compile_context>
chip_gen: v5e
topology: v5e:2x2
jax: 0.10.0
libtpu: 0.0.40
codegen_flags: <defaults>
</compile_context>

<pallas_src>
import math
import numpy as np
import jax
import jax.numpy as jnp
from jax import lax
from jax.experimental import pallas as pl
from jax.experimental.pallas import tpu as pltpu

EPS = 1e-5
NEG_SLOPE = 0.2
KSIZE = 4


def _vmem_capacity_bytes():
    """Generation-aware VMEM capacity (128 MiB v5e/v6e, 64 MiB/TC v7x)."""
    try:
        cap = getattr(pltpu.get_tpu_info(), "vmem_capacity_bytes", None)
        if cap:
            return int(cap)
    except Exception:
        pass
    return 128 * 1024 * 1024


def _pick_rows_per_tile(H_out, Wph_pad, W_out_pad, CK, Q, C_out, itemsize, vmem_cap):
    """Largest divisor of H_out whose per-step working set fits the VMEM budget."""
    K_total = Q * Q * CK
    budget = int(0.70 * vmem_cap)
    fixed = 2 * (H_out * W_out_pad) * C_out * 4 + 2 * K_total * C_out * itemsize
    best = 1
    for d in range(1, H_out + 1):
        if H_out % d:
            continue
        tile_p = d * W_out_pad
        need = (2 * (d + Q - 1) * Wph_pad * CK * itemsize   # double-buffered input slab
                + tile_p * K_total * itemsize               # concatenated LHS temporary
                + 2 * tile_p * C_out * 4)                   # f32 matmul result temp
        if fixed + need <= budget:
            best = d
    return best


def _make_kernel(Q, T, TH, W_out, W_out_pad, CK, C_out, P_valid):
    """Fused conv (one big-K MXU matmul) + streamed instance-norm + LeakyReLU."""
    tile_p = TH * W_out_pad
    has_pad = (W_out_pad != W_out)

    def kernel(xt_ref, w_ref, o_ref, sum_ref, ssq_ref):
        # xt_ref : (1, 1, TH+Q-1, Wph_pad, CK)  phase-stacked input slab for this tile
        # w_ref  : (Q*Q*CK, C_out)              single big-K weight matrix
        # o_ref  : (1, P_pad, C_out)            full image, resident across the tile axis
        # sum_ref, ssq_ref : (1, C_out) f32     streamed per-channel statistics
        t = pl.program_id(1)

        # --- convolution: one MXU matmul with K = Q*Q*CK = 16*C_in ------------------
        pieces = []
        for qh in range(Q):
            for qw in range(Q):
                sl = xt_ref[0, 0, pl.ds(qh, TH), pl.ds(qw, W_out_pad), :]
                pieces.append(sl.reshape(tile_p, CK))        # W_out_pad % 8 == 0 -> free
        lhs = pieces[0] if len(pieces) == 1 else jnp.concatenate(pieces, axis=-1)
        acc = jnp.dot(lhs, w_ref[...], preferred_element_type=jnp.float32)
        # conv bias intentionally omitted: InstanceNorm2d(affine=False) cancels it.

        # --- streamed instance-norm statistics (per-tile partial sums) --------------
        if has_pad:
            col = lax.broadcasted_iota(jnp.int32, (tile_p, C_out), 0) % W_out_pad
            acc_s = jnp.where(col < W_out, acc, 0.0)          # exclude alignment padding
        else:
            acc_s = acc

        @pl.when(t == 0)
        def _init():
            sum_ref[...] = jnp.zeros_like(sum_ref)
            ssq_ref[...] = jnp.zeros_like(ssq_ref)

        sum_ref[...] += jnp.sum(acc_s, axis=0, keepdims=True)
        ssq_ref[...] += jnp.sum(acc_s * acc_s, axis=0, keepdims=True)

        off = pl.multiple_of(t * tile_p, tile_p)              # tile_p % 8 == 0 -> aligned
        o_ref[0, pl.ds(off, tile_p), :] = acc

        # --- finalize on the last tile: normalize + LeakyReLU in place --------------
        @pl.when(t == T - 1)
        def _finalize():
            inv_n = 1.0 / float(P_valid)
            mean = sum_ref[...] * inv_n
            var = jnp.maximum(ssq_ref[...] * inv_n - mean * mean, 0.0)
            scale = lax.rsqrt(var + EPS)
            y = (o_ref[0] - mean) * scale
            o_ref[0] = jnp.where(y > 0.0, y, NEG_SLOPE * y)

    return kernel


def block_forward(x, weight, bias, stride, rows_per_tile=None,
                  compute_dtype=jnp.bfloat16):
    """x: (N, C_in, H, W) NCHW; weight: (C_out, C_in, 4, 4) OIHW; bias: (C_out,)."""
    N, C_in, H, W = x.shape
    C_out = weight.shape[0]
    s = int(stride)
    del bias  # exactly cancelled by InstanceNorm2d(affine=False)

    Hp, Wp = H + 2, W + 2
    H_out = (Hp - KSIZE) // s + 1
    W_out = (Wp - KSIZE) // s + 1
    Q = -(-KSIZE // s)                        # taps per stride phase along one axis
    W_out_pad = ((W_out + 7) // 8) * 8        # sublane-align the flattened pixel axis
    Hph = H_out + Q - 1
    Wph_pad = W_out_pad + Q - 1
    CK = s * s * C_in                         # stride phases stacked on the lane axis
    K_total = Q * Q * CK
    P_pad = H_out * W_out_pad
    P_valid = H_out * W_out
    itemsize = jnp.dtype(compute_dtype).itemsize

    vmem_cap = _vmem_capacity_bytes()
    if rows_per_tile is None:
        rows_per_tile = _pick_rows_per_tile(H_out, Wph_pad, W_out_pad, CK, Q,
                                            C_out, itemsize, vmem_cap)
    TH = int(rows_per_tile)
    assert H_out % TH == 0, "rows_per_tile must divide H_out"
    T = H_out // TH
    THQ = TH + Q - 1
    tile_p = TH * W_out_pad

    # ---- wrapper prep (one XLA fusion over ~input-sized data):
    #      reflect pad -> NHWC -> stride-phase channel stacking -> row-tile windows.
    xh = jnp.transpose(x, (0, 2, 3, 1)).astype(compute_dtype)
    xp = jnp.pad(xh, ((0, 0), (1, 1), (1, 1), (0, 0)), mode="reflect")   # (N,Hp,Wp,C)
    Hps, Wps = Hph * s, Wph_pad * s
    xp = xp[:, :min(Hp, Hps), :min(Wp, Wps), :]
    xp = jnp.pad(xp, ((0, 0), (0, Hps - xp.shape[1]), (0, Wps - xp.shape[2]), (0, 0)))
    xph = xp.reshape(N, Hph, s, Wph_pad, s, C_in)
    xph = jnp.transpose(xph, (0, 1, 3, 2, 4, 5)).reshape(N, Hph, Wph_pad, CK)
    if T == 1:
        xt = xph.reshape(N, 1, Hph, Wph_pad, CK)
    else:
        row_idx = jnp.arange(T)[:, None] * TH + jnp.arange(THQ)[None, :]  # (T, THQ)
        xt = xph[:, row_idx, :, :]                                        # (N,T,THQ,Wph_pad,CK)

    # ---- single (K_total, C_out) weight matrix matching the LHS K ordering ---------
    w_blk = jnp.zeros((Q, Q, s, s, C_in, C_out), jnp.float32)
    for kh in range(KSIZE):
        for kw in range(KSIZE):
            w_blk = w_blk.at[kh // s, kw // s, kh % s, kw % s].set(weight[:, :, kh, kw].T)
    w2 = w_blk.reshape(K_total, C_out).astype(compute_dtype)

    # ---- generation-aware VMEM limit ------------------------------------------------
    est = (2 * THQ * Wph_pad * CK * itemsize + 2 * K_total * C_out * itemsize
           + 2 * P_pad * C_out * 4 + tile_p * K_total * itemsize + 2 * tile_p * C_out * 4)
    vmem_limit = int(min(0.9 * vmem_cap, max(2 * est, 32 * 1024 * 1024)))

    kernel = _make_kernel(Q, T, TH, W_out, W_out_pad, CK, C_out, P_valid)

    out = pl.pallas_call(
        kernel,
        out_shape=jax.ShapeDtypeStruct((N, P_pad, C_out), jnp.float32),
        grid=(N, T),
        in_specs=[
            pl.BlockSpec((1, 1, THQ, Wph_pad, CK), lambda n, t: (n, t, 0, 0, 0)),
            pl.BlockSpec((K_total, C_out), lambda n, t: (0, 0)),
        ],
        out_specs=pl.BlockSpec((1, P_pad, C_out), lambda n, t: (n, 0, 0)),
        scratch_shapes=[pltpu.VMEM((1, C_out), jnp.float32),
                        pltpu.VMEM((1, C_out), jnp.float32)],
        compiler_params=pltpu.CompilerParams(
            dimension_semantics=("parallel", "arbitrary"),
            vmem_limit_bytes=vmem_limit),
    )(xt, w2)

    # (N, P_pad, C_out) -> drop alignment padding -> NCHW
    out = out.reshape(N, H_out, W_out_pad, C_out)[:, :, :W_out, :]
    return jnp.transpose(out, (0, 3, 1, 2))


def block_reference(x, weight, bias, stride):
    """Pure-JAX reference matching the PyTorch module semantics."""
    xp = jnp.pad(x, ((0, 0), (0, 0), (1, 1), (1, 1)), mode="reflect")
    conv = lax.conv_general_dilated(
        xp, weight, window_strides=(stride, stride), padding="VALID",
        dimension_numbers=("NCHW", "OIHW", "NCHW"))
    conv = conv + bias[None, :, None, None]
    mean = jnp.mean(conv, axis=(2, 3), keepdims=True)
    var = jnp.mean((conv - mean) ** 2, axis=(2, 3), keepdims=True)
    y = (conv - mean) * lax.rsqrt(var + EPS)
    return jnp.where(y > 0, y, NEG_SLOPE * y)


if __name__ == "__main__":
    N, C_in, C_out, H, W, stride = 2, 4, 8, 16, 16, 2

    key = jax.random.PRNGKey(0)
    kx, kw, kb = jax.random.split(key, 3)
    x = jax.random.normal(kx, (N, C_in, H, W), dtype=jnp.float32)
    fan_in = C_in * KSIZE * KSIZE
    bound = 1.0 / math.sqrt(fan_in)
    weight = jax.random.uniform(kw, (C_out, C_in, KSIZE, KSIZE), jnp.float32, -bound, bound)
    bias = jax.random.uniform(kb, (C_out,), jnp.float32, -bound, bound)

    fwd = jax.jit(block_forward,
                  static_argnames=("stride", "rows_per_tile", "compute_dtype"))

    ref = jax.block_until_ready(block_reference(x, weight, bias, stride))

    # 1) f32 path, auto tile size (T=1): bit-tight check against the module semantics.
    out_f32 = jax.block_until_ready(
        fwd(x, weight, bias, stride=stride, compute_dtype=jnp.float32))
    np.testing.assert_allclose(np.asarray(out_f32), np.asarray(ref), rtol=2e-4, atol=2e-4)

    # 2) bf16 fast path, forced 2 row-tiles: exercises streamed stats + pl.when finalize.
    #    Compared against the reference run on bf16-rounded inputs (quantization apart,
    #    the kernel math is identical; accumulation stays f32).
    ref_bf16 = jax.block_until_ready(block_reference(
        x.astype(jnp.bfloat16).astype(jnp.float32),
        weight.astype(jnp.bfloat16).astype(jnp.float32), bias, stride))
    out_bf16 = jax.block_until_ready(
        fwd(x, weight, bias, stride=stride, rows_per_tile=4, compute_dtype=jnp.bfloat16))
    np.testing.assert_allclose(np.asarray(out_bf16), np.asarray(ref_bf16),
                               rtol=2e-3, atol=2e-3)

    # 3) Non-aligned spatial size (W_out=9 -> padded to 16) with 3 row-tiles:
    #    exercises the masked-statistics path and the halo-tiled input.
    H2 = W2 = 18
    x2 = jax.random.normal(jax.random.PRNGKey(1), (N, C_in, H2, W2), dtype=jnp.float32)
    ref2 = jax.block_until_ready(block_reference(x2, weight, bias, stride))
    out2 = jax.block_until_ready(
        fwd(x2, weight, bias, stride=stride, rows_per_tile=3, compute_dtype=jnp.float32))
    np.testing.assert_allclose(np.asarray(out2), np.asarray(ref2), rtol=2e-4, atol=2e-4)

    print("KERNEL_OK")
</pallas_src>

<mosaic_0001>
module attributes {stable_mosaic.version = 11 : i64} {
  func.func @kernel(%arg0: i32, %arg1: i32, %arg2: memref<1x1x9x9x16xf32, #tpu.memory_space<vmem>>, %arg3: memref<64x8xf32, #tpu.memory_space<vmem>>, %arg4: memref<1x64x8xf32, #tpu.memory_space<vmem>>, %arg5: memref<1x8xf32, #tpu.memory_space<vmem>>, %arg6: memref<1x8xf32, #tpu.memory_space<vmem>>) attributes {dimension_semantics = [#tpu.dimension_semantics<parallel>, #tpu.dimension_semantics<arbitrary>], iteration_bounds = array<i64: 2, 1>, scalar_prefetch = 0 : i64, scratch_operands = 2 : i64, tpu.core_type = #tpu.core_type<tc>, window_params = [{transform_indices = @transform_0, window_bounds = array<i64: 1, 1, 9, 9, 16>}, {pipeline_mode = #tpu.pipeline_mode<synchronous>, transform_indices = @transform_1, window_bounds = array<i64: 64, 8>}, {transform_indices = @transform_2, window_bounds = array<i64: 1, 64, 8>}]} {
    %c0 = arith.constant 0 : index
    %c0_0 = arith.constant 0 : index
    %c0_1 = arith.constant 0 : index
    %c0_2 = arith.constant 0 : index
    %c0_3 = arith.constant 0 : index
    %0 = vector.load %arg2[%c0, %c0_0, %c0_1, %c0_2, %c0_3] : memref<1x1x9x9x16xf32, #tpu.memory_space<vmem>>, vector<1x1x8x8x16xf32>
    %1 = vector.shape_cast %0 : vector<1x1x8x8x16xf32> to vector<8x8x16xf32>
    %2 = vector.shape_cast %1 : vector<8x8x16xf32> to vector<64x16xf32>
    %c0_4 = arith.constant 0 : index
    %c0_5 = arith.constant 0 : index
    %c0_6 = arith.constant 0 : index
    %c1 = arith.constant 1 : index
    %c0_7 = arith.constant 0 : index
    %3 = vector.load %arg2[%c0_4, %c0_5, %c0_6, %c1, %c0_7] : memref<1x1x9x9x16xf32, #tpu.memory_space<vmem>>, vector<1x1x8x8x16xf32>
    %4 = vector.shape_cast %3 : vector<1x1x8x8x16xf32> to vector<8x8x16xf32>
    %5 = vector.shape_cast %4 : vector<8x8x16xf32> to vector<64x16xf32>
    %c0_8 = arith.constant 0 : index
    %c0_9 = arith.constant 0 : index
    %c1_10 = arith.constant 1 : index
    %c0_11 = arith.constant 0 : index
    %c0_12 = arith.constant 0 : index
    %6 = vector.load %arg2[%c0_8, %c0_9, %c1_10, %c0_11, %c0_12] : memref<1x1x9x9x16xf32, #tpu.memory_space<vmem>>, vector<1x1x8x8x16xf32>
    %7 = vector.shape_cast %6 : vector<1x1x8x8x16xf32> to vector<8x8x16xf32>
    %8 = vector.shape_cast %7 : vector<8x8x16xf32> to vector<64x16xf32>
    %c0_13 = arith.constant 0 : index
    %c0_14 = arith.constant 0 : index
    %c1_15 = arith.constant 1 : index
    %c1_16 = arith.constant 1 : index
    %c0_17 = arith.constant 0 : index
    %9 = vector.load %arg2[%c0_13, %c0_14, %c1_15, %c1_16, %c0_17] : memref<1x1x9x9x16xf32, #tpu.memory_space<vmem>>, vector<1x1x8x8x16xf32>
    %10 = vector.shape_cast %9 : vector<1x1x8x8x16xf32> to vector<8x8x16xf32>
    %11 = vector.shape_cast %10 : vector<8x8x16xf32> to vector<64x16xf32>
    %12 = tpu.concatenate %2, %5, %8, %11 in 1 : vector<64x16xf32>, vector<64x16xf32>, vector<64x16xf32>, vector<64x16xf32> -> vector<64x64xf32>
    %c0_18 = arith.constant 0 : index
    %c0_19 = arith.constant 0 : index
    %13 = vector.load %arg3[%c0_18, %c0_19] : memref<64x8xf32, #tpu.memory_space<vmem>>, vector<64x8xf32>
    %cst = arith.constant dense<0.000000e+00> : vector<64x8xf32>
    %14 = tpu.matmul %12, %13, %cst {dimension_numbers = #tpu.dot_dimension_numbers<[1], [0], [0], [1], [0, 0, 1, 1], [], []>} : vector<64x64xf32>, vector<64x8xf32>, vector<64x8xf32> -> vector<64x8xf32>
    %c0_i32 = arith.constant 0 : i32
    %15 = arith.cmpi eq, %arg1, %c0_i32 : i32
    %16 = arith.extui %15 : i1 to i32
    %c0_i32_20 = arith.constant 0 : i32
    %17 = arith.cmpi ne, %16, %c0_i32_20 : i32
    scf.if %17 {
      %cst_35 = arith.constant 0.000000e+00 : f32
      %38 = vector.broadcast %cst_35 : f32 to vector<1x8xf32>
      %c0_36 = arith.constant 0 : index
      %c0_37 = arith.constant 0 : index
      %39 = vector.load %arg5[%c0_36, %c0_37] : memref<1x8xf32, #tpu.memory_space<vmem>>, vector<1x8xf32>
      tpu.vector_store %arg5[%c0_36, %c0_37], %38 {strides = array<i32>} : memref<1x8xf32, #tpu.memory_space<vmem>>, vector<1x8xf32>,
      %cst_38 = arith.constant 0.000000e+00 : f32
      %40 = vector.broadcast %cst_38 : f32 to vector<1x8xf32>
      %c0_39 = arith.constant 0 : index
      %c0_40 = arith.constant 0 : index
      %41 = vector.load %arg6[%c0_39, %c0_40] : memref<1x8xf32, #tpu.memory_space<vmem>>, vector<1x8xf32>
      tpu.vector_store %arg6[%c0_39, %c0_40], %40 {strides = array<i32>} : memref<1x8xf32, #tpu.memory_space<vmem>>, vector<1x8xf32>,
    } else {
    }
    %c0_21 = arith.constant 0 : index
    %c0_22 = arith.constant 0 : index
    %18 = vector.load %arg5[%c0_21, %c0_22] : memref<1x8xf32, #tpu.memory_space<vmem>>, vector<1x8xf32>
    %cst_23 = arith.constant dense<0.000000e+00> : vector<8xf32>
    %19 = vector.multi_reduction <add>, %14, %cst_23 [0] : vector<64x8xf32> to vector<8xf32>
    %20 = vector.shape_cast %19 : vector<8xf32> to vector<1x8xf32>
    %21 = arith.addf %18, %20 : vector<1x8xf32>
    %c0_24 = arith.constant 0 : index
    %c0_25 = arith.constant 0 : index
    %22 = vector.load %arg5[%c0_24, %c0_25] : memref<1x8xf32, #tpu.memory_space<vmem>>, vector<1x8xf32>
    tpu.vector_store %arg5[%c0_24, %c0_25], %21 {strides = array<i32>} : memref<1x8xf32, #tpu.memory_space<vmem>>, vector<1x8xf32>,
    %c0_26 = arith.constant 0 : index
    %c0_27 = arith.constant 0 : index
    %23 = vector.load %arg6[%c0_26, %c0_27] : memref<1x8xf32, #tpu.memory_space<vmem>>, vector<1x8xf32>
    %24 = arith.mulf %14, %14 : vector<64x8xf32>
    %cst_28 = arith.constant dense<0.000000e+00> : vector<8xf32>
    %25 = vector.multi_reduction <add>, %24, %cst_28 [0] : vector<64x8xf32> to vector<8xf32>
    %26 = vector.shape_cast %25 : vector<8xf32> to vector<1x8xf32>
    %27 = arith.addf %23, %26 : vector<1x8xf32>
    %c0_29 = arith.constant 0 : index
    %c0_30 = arith.constant 0 : index
    %28 = vector.load %arg6[%c0_29, %c0_30] : memref<1x8xf32, #tpu.memory_space<vmem>>, vector<1x8xf32>
    tpu.vector_store %arg6[%c0_29, %c0_30], %27 {strides = array<i32>} : memref<1x8xf32, #tpu.memory_space<vmem>>, vector<1x8xf32>,
    %c64_i32 = arith.constant 64 : i32
    %29 = arith.muli %arg1, %c64_i32 : i32
    %30 = tpu.assume_multiple %29, 64 : i32
    %c0_31 = arith.constant 0 : index
    %31 = arith.index_cast %30 : i32 to index
    %c0_32 = arith.constant 0 : index
    %32 = vector.load %arg4[%c0_31, %31, %c0_32] : memref<1x64x8xf32, #tpu.memory_space<vmem>>, vector<1x64x8xf32>
    %33 = vector.shape_cast %32 : vector<1x64x8xf32> to vector<64x8xf32>
    %34 = vector.shape_cast %14 : vector<64x8xf32> to vector<1x64x8xf32>
    tpu.vector_store %arg4[%c0_31, %31, %c0_32], %34 {strides = array<i32>} : memref<1x64x8xf32, #tpu.memory_space<vmem>>, vector<1x64x8xf32>,
    %c0_i32_33 = arith.constant 0 : i32
    %35 = arith.cmpi eq, %arg1, %c0_i32_33 : i32
    %36 = arith.extui %35 : i1 to i32
    %c0_i32_34 = arith.constant 0 : i32
    %37 = arith.cmpi ne, %36, %c0_i32_34 : i32
    scf.if %37 {
      %c0_35 = arith.constant 0 : index
      %c0_36 = arith.constant 0 : index
      %38 = vector.load %arg5[%c0_35, %c0_36] : memref<1x8xf32, #tpu.memory_space<vmem>>, vector<1x8xf32>
      %cst_37 = arith.constant 1.562500e-02 : f32
      %39 = vector.broadcast %cst_37 : f32 to vector<1x8xf32>
      %40 = arith.mulf %38, %39 : vector<1x8xf32>
      %c0_38 = arith.constant 0 : index
      %c0_39 = arith.constant 0 : index
      %41 = vector.load %arg6[%c0_38, %c0_39] : memref<1x8xf32, #tpu.memory_space<vmem>>, vector<1x8xf32>
      %cst_40 = arith.constant 1.562500e-02 : f32
      %42 = vector.broadcast %cst_40 : f32 to vector<1x8xf32>
      %43 = arith.mulf %41, %42 : vector<1x8xf32>
      %44 = arith.mulf %40, %40 : vector<1x8xf32>
      %45 = arith.subf %43, %44 : vector<1x8xf32>
      %cst_41 = arith.constant 0.000000e+00 : f32
      %46 = vector.broadcast %cst_41 : f32 to vector<1x8xf32>
      %47 = arith.maximumf %45, %46 : vector<1x8xf32>
      %cst_42 = arith.constant 9.99999974E-6 : f32
      %48 = vector.broadcast %cst_42 : f32 to vector<1x8xf32>
      %49 = arith.addf %47, %48 : vector<1x8xf32>
      %50 = math.rsqrt %49 : vector<1x8xf32>
      %c0_43 = arith.constant 0 : index
      %c0_44 = arith.constant 0 : index
      %c0_45 = arith.constant 0 : index
      %51 = vector.load %arg4[%c0_43, %c0_44, %c0_45] : memref<1x64x8xf32, #tpu.memory_space<vmem>>, vector<1x64x8xf32>
      %52 = vector.shape_cast %51 : vector<1x64x8xf32> to vector<64x8xf32>
      %53 = vector.broadcast %40 : vector<1x8xf32> to vector<64x8xf32>
      %54 = arith.subf %52, %53 : vector<64x8xf32>
      %55 = vector.broadcast %50 : vector<1x8xf32> to vector<64x8xf32>
      %56 = arith.mulf %54, %55 : vector<64x8xf32>
      %cst_46 = arith.constant 0.000000e+00 : f32
      %57 = vector.broadcast %cst_46 : f32 to vector<64x8xf32>
      %58 = arith.cmpf ogt, %56, %57 : vector<64x8xf32>
      %cst_47 = arith.constant 2.000000e-01 : f32
      %59 = vector.broadcast %cst_47 : f32 to vector<64x8xf32>
      %60 = arith.mulf %59, %56 : vector<64x8xf32>
      %61 = arith.select %58, %56, %60 : vector<64x8xi1>, vector<64x8xf32>
      %c0_48 = arith.constant 0 : index
      %c0_49 = arith.constant 0 : index
      %c0_50 = arith.constant 0 : index
      %62 = vector.load %arg4[%c0_48, %c0_49, %c0_50] : memref<1x64x8xf32, #tpu.memory_space<vmem>>, vector<1x64x8xf32>
      %63 = vector.shape_cast %62 : vector<1x64x8xf32> to vector<64x8xf32>
      %64 = vector.shape_cast %61 : vector<64x8xf32> to vector<1x64x8xf32>
      tpu.vector_store %arg4[%c0_48, %c0_49, %c0_50], %64 {strides = array<i32>} : memref<1x64x8xf32, #tpu.memory_space<vmem>>, vector<1x64x8xf32>,
    } else {
    }
    return
  }
  func.func @transform_0(%arg0: i32, %arg1: i32) -> (i32, i32, i32, i32, i32) {
    %c0_i32 = arith.constant 0 : i32
    %c0_i32_0 = arith.constant 0 : i32
    %c0_i32_1 = arith.constant 0 : i32
    %c0_i32_2 = arith.constant 0 : i32
    return %arg0, %arg1, %c0_i32, %c0_i32_0, %c0_i32_1 : i32, i32, i32, i32, i32
  }
  func.func @transform_1(%arg0: i32, %arg1: i32) -> (i32, i32) {
    %c0_i32 = arith.constant 0 : i32
    %c0_i32_0 = arith.constant 0 : i32
    %c0_i32_1 = arith.constant 0 : i32
    return %c0_i32, %c0_i32_0 : i32, i32
  }
  func.func @transform_2(%arg0: i32, %arg1: i32) -> (i32, i32, i32) {
    %c0_i32 = arith.constant 0 : i32
    %c0_i32_0 = arith.constant 0 : i32
    %c0_i32_1 = arith.constant 0 : i32
    return %arg0, %c0_i32, %c0_i32_0 : i32, i32, i32
  }
}

</mosaic_0001>

<bundles_post_ra>
// kernel: block_forward.1
= control target key start
LH: loop header
LB: loop body
LE: loop exit
PB: predicated region body
PF: predicated region fallthrough
CT: control target
= control target key end

     0   :  { %s765_s9 = smov 0   ;;  %s767_s10 = smov 0   ;;  %s989_s0 = inlined_call_operand.vmem [shape: f32[2,1,9,9,16], index: 0, kind: input, shape index: {}]   ;;  %s990_s1 = inlined_call_operand.vmem [shape: f32[64,8], index: 1, kind: input, shape index: {}]   ;;  %s991_s2 = inlined_call_operand.vmem [shape: f32[2,64,8], index: 2, kind: output, shape index: {}]  }
   0x1   :  { %s769_s11 = smov 0  }
   0x2 LB: > { %s24_s12 = sadd.s32 1, %s740_s10  ;;  %p636_p0 = scmp.ge.s32.totalorder %s744_s11, 1  ;;  %s744_s11 = sphi %s769_s11, %s12_s11   ;;  %s740_s10 = sphi %s767_s10, %s993_s10   ;;  %s736_s9 = sphi %s765_s9, %s992_s9  }
   0x3   : > { %p26_p1 = scmp.ge.s32.totalorder %s24_s12, 2  ;;  %p130_p2 = scmp.lt.s32.totalorder %s744_s11, 3 }
   0x5   : > { %s995_s12 = smov (%p26_p1, %s24_s12), 0  ;;  %p131_p3 = pnand %p636_p0, %p130_p2 }
   0x6   : > { %p156_p4 = scmp.lt.s32.totalorder (!%p131_p3), %s736_s9, 1  ;;  %s746_s17 = smov (!%p131_p3), 16  }
   0x7   : > { %134 = sbr.rel (%p131_p3) target bundleno = 393 (0x189), region = 28  ;;  %s747_s18 = smov (!%p131_p3), 32  }
   0x8   : > { %s748_s19 = smov (!%p131_p3), 48  }
   0xc   : > { %s997_s9 = smov (!%p156_p4, %s736_s9), 1  ;;  %v333_v11 = vld [vmem:[%s990_s1 + $0x38] sm:$0xff]  ;;  %v332_v12 = vld [vmem:[%s990_s1 + $0x30] sm:$0xff]  ;;  %v331_v15 = vld [vmem:[%s990_s1 + $0x28] sm:$0xff]  ;;  %vm299_vm0 = vcmask 130048   ;;  %vm317_vm1 = vcmask 392192  }
   0xd   : > { %s691_s13 = smul.u32 144, %s997_s9  ;;  %367 = vmatpush.msra.mxu0 %v333_v11  ;;  %668 = vmatpush.msra.mxu2 %v333_v11  ;;  %v330_v20 = vld [vmem:[%s990_s1 + $0x20] sm:$0xff]  ;;  %v329_v21 = vld [vmem:[%s990_s1 + $0x18] sm:$0xff]  ;;  %v328_v22 = vld [vmem:[%s990_s1 + $0x10] sm:$0xff]  ;;  %vm308_vm2 = vcmask 261120   ;;  %vm334_vm3 = vcmask 523264  }
   0xe   : > { %667 = vmatpush.msra.mxu1 %v333_v11  ;;  %669 = vmatpush.msra.mxu3 %v333_v11  ;;  %v327_v23 = vld [vmem:[%s990_s1 + $0x8] sm:$0xff]  ;;  %v326_v24 = vld [vmem:[%s990_s1] sm:$0xff]  ;;  %s666_s8 = sshll.u32 %s997_s9, 6  ;;  %vm408_vm4 = vcmask 64512   ;;  %vm404_vm5 = vcmask 57344  }
   0xf   : > { %s789_s16 = scalar_lea.vmem %s989_s0, %s691_s13  ;;  %368 = vmatpush.msra.mxu0 %v332_v12  ;;  %671 = vmatpush.msra.mxu2 %v332_v12  ;;  %s917_s15 = scalar_lea.vmem %s991_s2, %s666_s8 }
  0x10   : > { %v182_v0 = vld [vmem:[%s789_s16 + $0x41] sm:$0xff]  ;;  %v796_v2 = vld [vmem:[%s789_s16 + $0x50] sm:$0xff]  ;;  %670 = vmatpush.msra.mxu1 %v332_v12  ;;  %672 = vmatpush.msra.mxu3 %v332_v12 }
  0x11   : > { %v178_v1 = vld [vmem:[%s789_s16 + $0x1] sm:$0xff]  ;;  %219 = vrot.lane.b32.xlu1 %v182_v0, %s746_s17  ;;  %251 = vrot.lane.b32.xlu2 %v796_v2, %s747_s18  ;;  %v648_v3 = vld [vmem:[%s789_s16 + $0x11] sm:$0xff] }
  0x12   : > { %211 = vrot.lane.b32.xlu0 %v178_v1, %s746_s17  ;;  %v802_v4 = vld [vmem:[%s789_s16 + $0x10] sm:$0xff]  ;;  %v180_v5 = vld [vmem:[%s789_s16 + $0x21] sm:$0xff]  ;;  %369 = vmatpush.msra.mxu0 %v331_v15 }
  0x13   : > { %v810_v6 = vld [vmem:[%s789_s16 + $0x30] sm:$0xff]  ;;  %v184_v8 = vld [vmem:[%s789_s16 + $0x61] sm:$0xff]  ;;  %674 = vmatpush.msra.mxu2 %v331_v15  ;;  %673 = vmatpush.msra.mxu1 %v331_v15 }
  0x14   : > { %v652_v7 = vld [vmem:[%s789_s16 + $0x51] sm:$0xff]  ;;  %v833_v13 = vld [vmem:[%s789_s16 + $0x20] sm:$0xff]  ;;  %675 = vmatpush.msra.mxu3 %v331_v15  ;;  %370 = vmatpush.msra.mxu0 %v330_v20 }
  0x15   : > { %v819_v9 = vld [vmem:[%s789_s16 + $0x70] sm:$0xff]  ;;  %v844_v16 = vld [vmem:[%s789_s16 + $0x60] sm:$0xff]  ;;  %677 = vmatpush.msra.mxu2 %v330_v20  ;;  %676 = vmatpush.msra.mxu1 %v330_v20 }
  0x16   : > { %v650_v10 = vld [vmem:[%s789_s16 + $0x31] sm:$0xff]  ;;  %v643_v17 = vld [vmem:[%s789_s16 + $0x40] sm:$0xff]  ;;  %678 = vmatpush.msra.mxu3 %v330_v20  ;;  %371 = vmatpush.msra.mxu0 %v329_v21 }
  0x17   : > { %v654_v14 = vld [vmem:[%s789_s16 + $0x71] sm:$0xff]  ;;  %v647_v18 = vld [vmem:[%s789_s16 + $0x80] sm:$0xff]  ;;  %680 = vmatpush.msra.mxu2 %v329_v21  ;;  %679 = vmatpush.msra.mxu1 %v329_v21 }
  0x18   : > { %v655_v19 = vld [vmem:[%s789_s16 + $0x81] sm:$0xff]  ;;  %681 = vmatpush.msra.mxu3 %v329_v21  ;;  %372 = vmatpush.msra.mxu0 %v328_v22 }
  0x19   : > { %275 = vrot.lane.b32.xlu1 %v648_v3, %s748_s19  ;;  %215 = vrot.lane.b32.xlu2 %v180_v5, %s746_s17  ;;  %v170_v29 = vld [vmem:[%s789_s16] sm:$0xff] }
  0x1a   : > { %243 = vrot.lane.b32.xlu0 %v802_v4, %s747_s18  ;;  %683 = vmatpush.msra.mxu2 %v328_v22 }
  0x1b   : > { %682 = vmatpush.msra.mxu1 %v328_v22  ;;  %684 = vmatpush.msra.mxu3 %v328_v22 }
  0x1c   : > { %373 = vmatpush.msra.mxu0 %v327_v23  ;;  %686 = vmatpush.msra.mxu2 %v327_v23 }
  0x1d   : > { %685 = vmatpush.msra.mxu1 %v327_v23  ;;  %687 = vmatpush.msra.mxu3 %v327_v23 }
  0x1e   : > { %374 = vmatpush.msra.mxu0 %v326_v24  ;;  %689 = vmatpush.msra.mxu2 %v326_v24 }
  0x1f   : > { %688 = vmatpush.msra.mxu1 %v326_v24  ;;  %690 = vmatpush.msra.mxu3 %v326_v24 }
  0x21   : > { %247 = vrot.lane.b32.xlu1 %v810_v6, %s747_s18  ;;  %223 = vrot.lane.b32.xlu2 %v184_v8, %s746_s17 }
  0x22   : > { %283 = vrot.lane.b32.xlu0 %v652_v7, %s748_s19 }
  0x29   : > { %255 = vrot.lane.b32.xlu1 %v819_v9, %s747_s18  ;;  %213 = vrot.lane.b32.xlu2 %v648_v3, %s746_s17 }
  0x2a   : > { %279 = vrot.lane.b32.xlu0 %v650_v10, %s748_s19 }
  0x31   : > { %245 = vrot.lane.b32.xlu1 %v833_v13, %s747_s18  ;;  %221 = vrot.lane.b32.xlu2 %v652_v7, %s746_s17 }
  0x32   : > { %287 = vrot.lane.b32.xlu0 %v654_v14, %s748_s19 }
  0x39   : > { %253 = vrot.lane.b32.xlu1 %v844_v16, %s747_s18  ;;  %217 = vrot.lane.b32.xlu2 %v650_v10, %s746_s17 }
  0x3a   : > { %277 = vrot.lane.b32.xlu0 %v180_v5, %s748_s19 }
  0x41   : > { %249 = vrot.lane.b32.xlu1 %v643_v17, %s747_s18  ;;  %225 = vrot.lane.b32.xlu2 %v654_v14, %s746_s17 }
  0x42   : > { %285 = vrot.lane.b32.xlu0 %v184_v8, %s748_s19 }
  0x49   : > { %257 = vrot.lane.b32.xlu1 %v647_v18, %s747_s18  ;;  %289 = vrot.lane.b32.xlu2 %v655_v19, %s748_s19 }
  0x4a   : > { %281 = vrot.lane.b32.xlu0 %v182_v0, %s748_s19 }
  0x6b   : > { %v252_v25 = vpop.permute.xlu2 %251 }
  0x73   : > { %v216_v26 = vpop.permute.xlu2 %215 }
  0x74   : > { %v302_v42 = vsel %vm299_vm0, %v833_v13, %v216_v26  ;;  %v749_v13 = vmov 0.0  }
  0x75   : > { %405 = vst.msk [vmem:[#allocation2] sm:$0x1] %vm404_vm5, %v749_v13 }
  0x76   : > { %406 = vst.msk [vmem:[#allocation3] sm:$0x1] %vm404_vm5, %v749_v13 }
  0x7b   : > { %v224_v30 = vpop.permute.xlu2 %223 }
  0x7c   : > { %v306_v48 = vsel %vm299_vm0, %v844_v16, %v224_v30 }
  0x83   : > { %v220_v27 = vpop.permute.xlu1 %219  ;;  %v214_v37 = vpop.permute.xlu2 %213 }
  0x84   : > { %v212_v28 = vpop.permute.xlu0 %211  ;;  %v304_v36 = vsel %vm299_vm0, %v643_v17, %v220_v27  ;;  %v301_v54 = vsel %vm299_vm0, %v802_v4, %v214_v37 }
  0x85   : > { %v300_v31 = vsel %vm299_vm0, %v170_v29, %v212_v28  ;;  %v313_v38 = vsel %vm308_vm2, %v304_v36, %v252_v25 }
  0x8b   : > { %v276_v32 = vpop.permute.xlu1 %275  ;;  %v222_v47 = vpop.permute.xlu2 %221 }
  0x8c   : > { %v244_v33 = vpop.permute.xlu0 %243  ;;  %v305_v60 = vsel %vm299_vm0, %v796_v2, %v222_v47 }
  0x8d   : > { %v309_v34 = vsel %vm308_vm2, %v300_v31, %v244_v33 }
  0x8e   : > { %v318_v35 = vsel %vm317_vm1, %v309_v34, %v276_v32 }
  0x8f   : > { %656 = vmatmul.msk.f32.vlgmr.msra.gmra.mxu0 %vm334_vm3, %v318_v35 }
  0x93   : > { %v248_v39 = vpop.permute.xlu1 %247  ;;  %v218_v53 = vpop.permute.xlu2 %217 }
  0x94   : > { %v284_v40 = vpop.permute.xlu0 %283  ;;  %v311_v43 = vsel %vm308_vm2, %v302_v42, %v248_v39  ;;  %v303_v1 = vsel %vm299_vm0, %v810_v6, %v218_v53 }
  0x95   : > { %v322_v41 = vsel %vm317_vm1, %v313_v38, %v284_v40 }
  0x96   : > { %660 = vmatmul.msk.f32.vlgmr.msra.gmra.mxu2 %vm334_vm3, %v322_v41 }
  0x9b   : > { %v256_v44 = vpop.permute.xlu1 %255  ;;  %v226_v59 = vpop.permute.xlu2 %225 }
  0x9c   : > { %v280_v45 = vpop.permute.xlu0 %279  ;;  %v315_v49 = vsel %vm308_vm2, %v306_v48, %v256_v44  ;;  %v307_v5 = vsel %vm299_vm0, %v819_v9, %v226_v59 }
  0x9d   : > { %v320_v46 = vsel %vm317_vm1, %v311_v43, %v280_v45 }
  0x9e   : > { %658 = vmatmul.msk.f32.vlgmr.msra.gmra.mxu1 %vm334_vm3, %v320_v46 }
  0xa3   : > { %v246_v50 = vpop.permute.xlu1 %245  ;;  %v290_v3 = vpop.permute.xlu2 %289 }
  0xa4   : > { %v288_v51 = vpop.permute.xlu0 %287  ;;  %v310_v55 = vsel %vm308_vm2, %v301_v54, %v246_v50 }
  0xa5   : > { %v324_v52 = vsel %vm317_vm1, %v315_v49, %v288_v51 }
  0xa6   : > { %662 = vmatmul.msk.f32.vlgmr.msra.gmra.mxu3 %vm334_vm3, %v324_v52 }
  0xab   : > { %v254_v56 = vpop.permute.xlu1 %253 }
  0xac   : > { %v278_v57 = vpop.permute.xlu0 %277  ;;  %v314_v61 = vsel %vm308_vm2, %v305_v60, %v254_v56 }
  0xad   : > { %v319_v58 = vsel %vm317_vm1, %v310_v55, %v278_v57 }
  0xae   : > { %657 = vmatmul.msk.f32.gmra.mxu0 %vm334_vm3, %v319_v58 }
  0xb3   : > { %v250_v62 = vpop.permute.xlu1 %249 }
  0xb4   : > { %v286_v63 = vpop.permute.xlu0 %285  ;;  %v312_v4 = vsel %vm308_vm2, %v303_v1, %v250_v62 }
  0xb5   : > { %v323_v0 = vsel %vm317_vm1, %v314_v61, %v286_v63 }
  0xb6   : > { %661 = vmatmul.msk.f32.gmra.mxu2 %vm334_vm3, %v323_v0 }
  0xbb   : > { %v258_v7 = vpop.permute.xlu1 %257 }
  0xbc   : > { %v282_v2 = vpop.permute.xlu0 %281  ;;  %v316_v8 = vsel %vm308_vm2, %v307_v5, %v258_v7  ;;  %v433_v7 = vld [vmem:[#allocation3] sm:$0x1] }
  0xbd   : > { %v321_v10 = vsel %vm317_vm1, %v312_v4, %v282_v2  ;;  %v325_v11 = vsel %vm317_vm1, %v316_v8, %v290_v3  ;;  %v407_v3 = vld [vmem:[#allocation2] sm:$0x1] }
  0xbe   : > { %659 = vmatmul.msk.f32.gmra.mxu1 %vm334_vm3, %v321_v10  ;;  %663 = vmatmul.msk.f32.gmra.mxu3 %vm334_vm3, %v325_v11 }
 0x10c   : > { %v376_v6 = vpop.f32.mrf.mxu0 }
 0x10d   : > { %467 = vst.msk [vmem:[%s917_s15] sm:$0xff] %vm408_vm4, %v376_v6  ;;  %v434_v17 = vmul.f32 %v376_v6, %v376_v6  ;;  %v409_v19 = vsel %vm408_vm4, %v376_v6, 0.0 }
 0x10f   : > { %v442_v22 = vsel %vm408_vm4, %v434_v17, 0.0 }
 0x119   : > { %v388_v9 = vpop.f32.mrf.mxu2 }
 0x11a   : > { %471 = vst.msk [vmem:[%s917_s15 + $0x20] sm:$0xff] %vm408_vm4, %v388_v9  ;;  %v438_v29 = vmul.f32 %v388_v9, %v388_v9  ;;  %v416_v35 = vsel %vm408_vm4, %v388_v9, 0.0 }
 0x11b   : > { %v382_v12 = vpop.f32.mrf.mxu1 }
 0x11c   : > { %469 = vst.msk [vmem:[%s917_s15 + $0x10] sm:$0xff] %vm408_vm4, %v382_v12  ;;  %v436_v23 = vmul.f32 %v382_v12, %v382_v12  ;;  %v412_v26 = vsel %vm408_vm4, %v382_v12, 0.0  ;;  %v449_v40 = vsel %vm408_vm4, %v438_v29, 0.0 }
 0x11e   : > { %v445_v30 = vsel %vm408_vm4, %v436_v23, 0.0 }
 0x129   : > { %v394_v14 = vpop.f32.mrf.mxu3 }
 0x12a   : > { %473 = vst.msk [vmem:[%s917_s15 + $0x30] sm:$0xff] %vm408_vm4, %v394_v14  ;;  %v440_v41 = vmul.f32 %v394_v14, %v394_v14  ;;  %v420_v45 = vsel %vm408_vm4, %v394_v14, 0.0 }
 0x12b   : > { %v379_v15 = vpop.f32.mrf.mxu0 }
 0x12c   : > { %468 = vst.msk [vmem:[%s917_s15 + $0x8] sm:$0xff] %vm408_vm4, %v379_v15  ;;  %v435_v16 = vmul.f32 %v379_v15, %v379_v15  ;;  %v410_v18 = vsel %vm408_vm4, %v379_v15, 0.0  ;;  %v453_v52 = vsel %vm408_vm4, %v440_v41, 0.0 }
 0x12d   : > { %v411_v21 = vadd.f32 %v410_v18, %v409_v19 }
 0x12e   : > { %v443_v20 = vsel %vm408_vm4, %v435_v16, 0.0 }
 0x12f   : > { %v444_v24 = vadd.f32 %v443_v20, %v442_v22  ;;  %v413_v28 = vadd.f32 %v412_v26, %v411_v21  ;;  %v498_v26 = vld [vmem:[%s917_s15 + $0x10] sm:$0xff] }
 0x131   : > { %v446_v34 = vadd.f32 %v445_v30, %v444_v24  ;;  %v496_v24 = vld [vmem:[%s917_s15] sm:$0xff] }
 0x139   : > { %v391_v25 = vpop.f32.mrf.mxu2 }
 0x13a   : > { %472 = vst.msk [vmem:[%s917_s15 + $0x28] sm:$0xff] %vm408_vm4, %v391_v25  ;;  %v439_v36 = vmul.f32 %v391_v25, %v391_v25  ;;  %v418_v42 = vsel %vm408_vm4, %v391_v25, 0.0  ;;  %v500_v25 = vld [vmem:[%s917_s15 + $0x20] sm:$0xff] }
 0x13b   : > { %v385_v27 = vpop.f32.mrf.mxu1 }
 0x13c   : > { %v414_v31 = vsel %vm408_vm4, %v385_v27, 0.0  ;;  %v437_v32 = vmul.f32 %v385_v27, %v385_v27  ;;  %470 = vst.msk [vmem:[%s917_s15 + $0x18] sm:$0xff] %vm408_vm4, %v385_v27  ;;  %v451_v46 = vsel %vm408_vm4, %v439_v36, 0.0  ;;  %v497_v27 = vld [vmem:[%s917_s15 + $0x8] sm:$0xff] }
 0x13d   : > { %v415_v33 = vadd.f32 %v414_v31, %v413_v28  ;;  %v502_v31 = vld [vmem:[%s917_s15 + $0x30] sm:$0xff] }
 0x13e   : > { %v447_v37 = vsel %vm408_vm4, %v437_v32, 0.0 }
 0x13f   : > { %v417_v38 = vadd.f32 %v416_v35, %v415_v33  ;;  %v448_v39 = vadd.f32 %v447_v37, %v446_v34 }
 0x141   : > { %v450_v43 = vadd.f32 %v449_v40, %v448_v39  ;;  %v419_v44 = vadd.f32 %v418_v42, %v417_v38  ;;  %v397_v47 = vpop.f32.mrf.mxu3  ;;  %v501_v32 = vld [vmem:[%s917_s15 + $0x28] sm:$0xff] }
 0x142   : > { %v422_v49 = vsel %vm408_vm4, %v397_v47, 0.0  ;;  %v441_v50 = vmul.f32 %v397_v47, %v397_v47  ;;  %474 = vst.msk [vmem:[%s917_s15 + $0x38] sm:$0xff] %vm408_vm4, %v397_v47 }
 0x143   : > { %v421_v48 = vadd.f32 %v420_v45, %v419_v44  ;;  %v452_v51 = vadd.f32 %v451_v46, %v450_v43  ;;  %v499_v28 = vld [vmem:[%s917_s15 + $0x18] sm:$0xff] }
 0x144   : > { %v455_v55 = vsel %vm408_vm4, %v441_v50, 0.0 }
 0x145   : > { %v423_v53 = vadd.f32 %v422_v49, %v421_v48  ;;  %v454_v54 = vadd.f32 %v453_v52, %v452_v51 }
 0x147   : > { %v424_v56 = vrot.slane %v423_v53, 4  ;;  %v456_v57 = vadd.f32 %v455_v55, %v454_v54 }
 0x149   : > { %v425_v58 = vadd.f32 %v424_v56, %v423_v53  ;;  %v457_v59 = vrot.slane %v456_v57, 4  ;;  %v503_v33 = vld [vmem:[%s917_s15 + $0x38] sm:$0xff] }
 0x14b   : > { %v426_v60 = vrot.slane %v425_v58, 2  ;;  %v458_v61 = vadd.f32 %v457_v59, %v456_v57 }
 0x14d   : > { %v427_v62 = vadd.f32 %v426_v60, %v425_v58  ;;  %v459_v63 = vrot.slane %v458_v61, 2 }
 0x14f   : > { %v428_v0 = vrot.slane %v427_v62, 1  ;;  %v460_v1 = vadd.f32 %v459_v63, %v458_v61 }
 0x151   : > { %v429_v4 = vadd.f32 %v428_v0, %v427_v62  ;;  %v461_v5 = vrot.slane %v460_v1, 1 }
 0x153   : > { %v430_v2 = vadd.f32 %v429_v4, %v407_v3  ;;  %v462_v8 = vadd.f32 %v461_v5, %v460_v1 }
 0x155   : > { %432 = vst.msk [vmem:[#allocation2] sm:$0x1] %vm404_vm5, %v430_v2  ;;  %v463_v10 = vadd.f32 %v462_v8, %v433_v7 }
 0x157   : > { %464 = vst.msk [vmem:[#allocation3] sm:$0x1] %vm404_vm5, %v463_v10 }
 0x15c   : > { %v478_v11 = vld [vmem:[#allocation2] sm:$0x1] }
 0x15d   : > { %v479_v6 = vmul.f32 0.015625, %v478_v11 }
 0x15e   : > { %v480_v9 = vld [vmem:[#allocation3] sm:$0x1] }
 0x15f   : > { %v481_v12 = vmul.f32 0.015625, %v480_v9  ;;  %v482_v13 = vmul.f32 %v479_v6, %v479_v6  ;;  %v505_v22 = vperm.slane %v479_v6, 0 }
 0x161   : > { %v483_v14 = vsub.f32 %v481_v12, %v482_v13  ;;  %v507_v30 = vsub.f32 %v496_v24, %v505_v22  ;;  %v508_v34 = vsub.f32 %v497_v27, %v505_v22  ;;  %v509_v35 = vsub.f32 %v498_v26, %v505_v22 }
 0x162   : > { %v510_v36 = vsub.f32 %v499_v28, %v505_v22  ;;  %v511_v38 = vsub.f32 %v500_v25, %v505_v22  ;;  %v512_v39 = vsub.f32 %v501_v32, %v505_v22  ;;  %v513_v40 = vsub.f32 %v502_v31, %v505_v22 }
 0x163   : > { %v484_v15 = vmax.f32 %v483_v14, 0.0  ;;  %v514_v41 = vsub.f32 %v503_v33, %v505_v22 }
 0x165   : > { %v485_v16 = vadd.f32 1e-05, %v484_v15 }
 0x167   : > { %720 = vrsqrt.f32 %v485_v16  ;;  %vm492_vm7 = vweird.f32 %v485_v16 }
 0x16d   : > { %v721_v17 = vpop.eup %720 }
 0x16e   : > { %v487_v18 = vmul.f32 %v721_v17, %v485_v16  ;;  %vm493_vm6 = vweird.f32 %v721_v17 }
 0x16f   : > { %vm494_vm8 = vmor %vm492_vm7, %vm493_vm6 }
 0x170   : > { %v488_v19 = vmul.f32 %v721_v17, %v487_v18 }
 0x172   : > { %v489_v20 = vmul.f32 0.5, %v488_v19 }
 0x174   : > { %v490_v21 = vsub.f32 1.5, %v489_v20 }
 0x176   : > { %v491_v23 = vmul.f32 %v721_v17, %v490_v21 }
 0x178   : > { %v495_v29 = vsel %vm494_vm8, %v721_v17, %v491_v23 }
 0x179   : > { %v516_v37 = vperm.slane %v495_v29, 0 }
 0x17b   : > { %v518_v42 = vmul.f32 %v516_v37, %v507_v30  ;;  %v519_v43 = vmul.f32 %v516_v37, %v508_v34  ;;  %v520_v44 = vmul.f32 %v516_v37, %v509_v35  ;;  %v521_v45 = vmul.f32 %v516_v37, %v510_v36 }
 0x17c   : > { %v522_v46 = vmul.f32 %v516_v37, %v511_v38  ;;  %v523_v47 = vmul.f32 %v516_v37, %v512_v39  ;;  %v524_v48 = vmul.f32 %v516_v37, %v513_v40  ;;  %v525_v49 = vmul.f32 %v516_v37, %v514_v41 }
 0x17d   : > { %vm526_vm9 = vcmp.gt.f32.partialorder %v518_v42, 0.0  ;;  %vm527_vm10 = vcmp.gt.f32.partialorder %v519_v43, 0.0  ;;  %vm528_vm11 = vcmp.gt.f32.partialorder %v520_v44, 0.0  ;;  %vm529_vm12 = vcmp.gt.f32.partialorder %v521_v45, 0.0 }
 0x17e   : > { %vm530_vm13 = vcmp.gt.f32.partialorder %v522_v46, 0.0  ;;  %v534_v50 = vmul.f32 0.2, %v518_v42  ;;  %v535_v51 = vmul.f32 0.2, %v519_v43  ;;  %vm531_vm14 = vcmp.gt.f32.partialorder %v523_v47, 0.0 }
 0x17f   : > { %v536_v52 = vmul.f32 0.2, %v520_v44  ;;  %v537_v53 = vmul.f32 0.2, %v521_v45  ;;  %v538_v54 = vmul.f32 0.2, %v522_v46 }
 0x180   : > { %v539_v55 = vmul.f32 0.2, %v523_v47  ;;  %v540_v56 = vmul.f32 0.2, %v524_v48  ;;  %v542_v57 = vsel %vm526_vm9, %v518_v42, %v534_v50  ;;  %v543_v58 = vsel %vm527_vm10, %v519_v43, %v535_v51 }
 0x181   : > { %vm532_vm15 = vcmp.gt.f32.partialorder %v524_v48, 0.0  ;;  %v541_v59 = vmul.f32 0.2, %v525_v49  ;;  %v544_v60 = vsel %vm528_vm11, %v520_v44, %v536_v52  ;;  %v545_v61 = vsel %vm529_vm12, %v521_v45, %v537_v53  ;;  %550 = vst.msk [vmem:[%s917_s15] sm:$0xff] %vm408_vm4, %v542_v57 }
 0x182   : > { %vm533_vm0 = vcmp.gt.f32.partialorder %v525_v49, 0.0  ;;  %v546_v62 = vsel %vm530_vm13, %v522_v46, %v538_v54  ;;  %551 = vst.msk [vmem:[%s917_s15 + $0x8] sm:$0xff] %vm408_vm4, %v543_v58  ;;  %v547_v63 = vsel %vm531_vm14, %v523_v47, %v539_v55  ;;  %v548_v0 = vsel %vm532_vm15, %v524_v48, %v540_v56 }
 0x183   : > { %552 = vst.msk [vmem:[%s917_s15 + $0x10] sm:$0xff] %vm408_vm4, %v544_v60  ;;  %v549_v1 = vsel %vm533_vm0, %v525_v49, %v541_v59 }
 0x184   : > { %553 = vst.msk [vmem:[%s917_s15 + $0x18] sm:$0xff] %vm408_vm4, %v545_v61 }
 0x185   : > { %554 = vst.msk [vmem:[%s917_s15 + $0x20] sm:$0xff] %vm408_vm4, %v546_v62 }
 0x186   : > { %555 = vst.msk [vmem:[%s917_s15 + $0x28] sm:$0xff] %vm408_vm4, %v547_v63 }
 0x187   : > { %556 = vst.msk [vmem:[%s917_s15 + $0x30] sm:$0xff] %vm408_vm4, %v548_v0 }
 0x188   : > { %557 = vst.msk [vmem:[%s917_s15 + $0x38] sm:$0xff] %vm408_vm4, %v549_v1 }
 0x189 PF: > { %s12_s11 = sadd.s32 1, %s744_s11   ;;  %s992_s9 = smov %s740_s10 }
 0x18a   : > { %p9_p5 = scmp.ge.s32.totalorder %s12_s11, 4   ;;  %s993_s10 = smov %s995_s12 }
 0x18c   :  { %11 = sbr.rel (!%p9_p5) target bundleno = 2 (0x2), region = 68 }

</bundles_post_ra>
